<compile_context>
chip_gen: v6e
topology: v6e:2x2x1
jax: 0.10.0
libtpu: 0.0.40
codegen_flags: <defaults>
</compile_context>

<pallas_src>
import functools

import jax
import jax.numpy as jnp
from jax.experimental import pallas as pl
from jax.experimental.pallas import tpu as pltpu

IN_F = 28 * 28   # 784
H1 = 512
H2 = 256


def mlp_kernel(x_ref, w1_ref, b1_ref, w2_ref, b2_ref, w3_ref, b3_ref, o_ref):
    # Layer 1 (MXU): cast x to bf16 in-kernel (x is read from HBM as f32 once),
    # (tm, 784)bf16 @ (784, 512)bf16 -> f32 accumulate.
    x_bf16 = x_ref[...].astype(jnp.bfloat16)
    h1 = jnp.dot(x_bf16, w1_ref[...], preferred_element_type=jnp.float32)
    h1 = jnp.maximum(h1 + b1_ref[...], 0.0)            # bias + ReLU in f32

    # Layer 2 (MXU): only the MXU operand is cast to bf16.
    h2 = jnp.dot(h1.astype(jnp.bfloat16), w2_ref[...],
                 preferred_element_type=jnp.float32)
    h2 = jnp.maximum(h2 + b2_ref[...], 0.0)

    # Layer 3: out_features == 1, so skip the MXU (it would use one of its 256
    # columns and still pay a full push/pop) -- VPU multiply + row reduce.
    logits = jnp.sum(h2 * w3_ref[...], axis=-1, keepdims=True) + b3_ref[...]

    # Sigmoid: exp on the EUP, and the divide also on the EUP via approx
    # reciprocal (keeps the VALU slot clear; exp(-x)->inf gives 0, no NaN).
    o_ref[...] = pl.reciprocal(1.0 + jnp.exp(-logits),
                               approx=True).astype(o_ref.dtype)


def prepare_params(params):
    """One-time conversion of f32 (in, out)-layout params to kernel layout."""
    w1, b1, w2, b2, w3, b3 = params
    return (
        w1.astype(jnp.bfloat16),                 # (784, 512) -- no K padding
        b1,                                      # (1, 512) f32
        w2.astype(jnp.bfloat16),                 # (512, 256)
        b2,                                      # (1, 256) f32
        w3.reshape(1, H2).astype(jnp.float32),   # (1, 256) row, used on the VPU
        b3,                                      # (1, 1) f32
    )


def _round_up(x, m):
    return ((x + m - 1) // m) * m


@functools.partial(jax.jit, static_argnames=("tm",))
def mnist_detector_forward(x, kparams, *, tm=None):
    """x: (B, 784) float32 -> (B, 1) float32.

    tm: batch rows per grid step (multiple of 8).  Default picks the largest
    tile <= 1024 that still leaves >= 2 grid steps when B allows it, so
    per-step overhead is amortized and v7x's two TensorCores both get work.
    The same large tm is correct on v5e/v6e (tm need not match MXU width).
    """
    w1, b1, w2, b2, w3, b3 = kparams
    B = x.shape[0]
    if tm is None:
        tm = min(1024, max(8, _round_up(pl.cdiv(B, 2), 8)))
    num_tiles = pl.cdiv(B, tm)

    cost = pl.CostEstimate(
        flops=2 * B * (IN_F * H1 + H1 * H2 + H2),
        transcendentals=B,
        bytes_accessed=(B * IN_F * 4                   # x (f32, read once)
                        + (IN_F * H1 + H1 * H2) * 2    # w1, w2 (bf16)
                        + (H1 + H2 + H2 + 1) * 4       # b1, b2, w3, b3 (f32)
                        + B * 4))                      # output (f32)

    # Weights/biases: constant block index -> DMA'd once, resident in VMEM.
    const = lambda s: pl.BlockSpec(s, lambda i: (0,) * len(s))

    out = pl.pallas_call(
        mlp_kernel,
        out_shape=jax.ShapeDtypeStruct((B, 1), jnp.float32),
        grid_spec=pltpu.PrefetchScalarGridSpec(
            num_scalar_prefetch=0,
            grid=(num_tiles,),
            in_specs=[
                pl.BlockSpec((tm, IN_F), lambda i: (i, 0)),  # x: batch-tiled
                const((IN_F, H1)),                           # w1 (bf16)
                const((1, H1)),                              # b1
                const((H1, H2)),                             # w2 (bf16)
                const((1, H2)),                              # b2
                const((1, H2)),                              # w3 (row, f32)
                const((1, 1)),                               # b3
            ],
            out_specs=pl.BlockSpec((tm, 1), lambda i: (i, 0)),
        ),
        compiler_params=pltpu.CompilerParams(
            dimension_semantics=("parallel",),   # v7x: 2 TCs split the batch
            vmem_limit_bytes=32 * 1024 * 1024),  # v5e default is 16 MiB; tm=1024 needs ~18 MB
        cost_estimate=cost,
    )(x, w1, b1, w2, b2, w3, b3)

    return out


def init_params(key):
    """Deterministic init mimicking PyTorch Linear's U(-1/sqrt(fan_in), +)."""
    dims = [(IN_F, H1), (H1, H2), (H2, 1)]
    params = []
    for fan_in, fan_out in dims:
        kw, kb, key = jax.random.split(key, 3)
        bound = 1.0 / jnp.sqrt(fan_in)
        w = jax.random.uniform(kw, (fan_in, fan_out), jnp.float32, -bound, bound)
        b = jax.random.uniform(kb, (1, fan_out), jnp.float32, -bound, bound)
        params += [w, b]
    return tuple(params)


def reference_forward(x, params):
    w1, b1, w2, b2, w3, b3 = params
    h1 = jnp.maximum(x @ w1 + b1, 0.0)
    h2 = jnp.maximum(h1 @ w2 + b2, 0.0)
    return jax.nn.sigmoid(h2 @ w3 + b3)


if __name__ == "__main__":
    key = jax.random.PRNGKey(0)
    kx, kp = jax.random.split(key)

    B = 8
    x = jax.random.normal(kx, (B, IN_F), jnp.float32)
    params = init_params(kp)

    out = mnist_detector_forward(x, prepare_params(params))
    out = jax.block_until_ready(out)

    ref = reference_forward(x, params)
    assert out.shape == (B, 1), out.shape
    err = float(jnp.max(jnp.abs(out - ref)))
    assert err < 1e-2, f"max abs err {err}"   # bf16 MXU operands vs f32 reference
    print("KERNEL_OK")
</pallas_src>

<mosaic_0001>
module attributes {stable_mosaic.version = 11 : i64} {
  func.func @mlp_kernel(%arg0: i32, %arg1: memref<8x784xf32, #tpu.memory_space<vmem>>, %arg2: memref<784x512xbf16, #tpu.memory_space<vmem>>, %arg3: memref<1x512xf32, #tpu.memory_space<vmem>>, %arg4: memref<512x256xbf16, #tpu.memory_space<vmem>>, %arg5: memref<1x256xf32, #tpu.memory_space<vmem>>, %arg6: memref<1x256xf32, #tpu.memory_space<vmem>>, %arg7: memref<1x1xf32, #tpu.memory_space<vmem>>, %arg8: memref<8x1xf32, #tpu.memory_space<vmem>>) attributes {dimension_semantics = [#tpu.dimension_semantics<parallel>], iteration_bounds = array<i64: 1>, scalar_prefetch = 0 : i64, scratch_operands = 0 : i64, tpu.core_type = #tpu.core_type<tc>, window_params = [{transform_indices = @transform_0, window_bounds = array<i64: 8, 784>}, {pipeline_mode = #tpu.pipeline_mode<synchronous>, transform_indices = @transform_1, window_bounds = array<i64: 784, 512>}, {pipeline_mode = #tpu.pipeline_mode<synchronous>, transform_indices = @transform_2, window_bounds = array<i64: 1, 512>}, {pipeline_mode = #tpu.pipeline_mode<synchronous>, transform_indices = @transform_3, window_bounds = array<i64: 512, 256>}, {pipeline_mode = #tpu.pipeline_mode<synchronous>, transform_indices = @transform_4, window_bounds = array<i64: 1, 256>}, {pipeline_mode = #tpu.pipeline_mode<synchronous>, transform_indices = @transform_5, window_bounds = array<i64: 1, 256>}, {pipeline_mode = #tpu.pipeline_mode<synchronous>, transform_indices = @transform_6, window_bounds = array<i64: 1, 1>}, {transform_indices = @transform_7, window_bounds = array<i64: 8, 1>}]} {
    %c0 = arith.constant 0 : index
    %c0_0 = arith.constant 0 : index
    %0 = vector.load %arg1[%c0, %c0_0] : memref<8x784xf32, #tpu.memory_space<vmem>>, vector<8x784xf32>
    %1 = arith.truncf %0 : vector<8x784xf32> to vector<8x784xbf16>
    %c0_1 = arith.constant 0 : index
    %c0_2 = arith.constant 0 : index
    %2 = vector.load %arg2[%c0_1, %c0_2] : memref<784x512xbf16, #tpu.memory_space<vmem>>, vector<784x512xbf16>
    %cst = arith.constant dense<0.000000e+00> : vector<8x512xf32>
    %3 = tpu.matmul %1, %2, %cst {dimension_numbers = #tpu.dot_dimension_numbers<[1], [0], [0], [1], [0, 0, 1, 1], [], []>} : vector<8x784xbf16>, vector<784x512xbf16>, vector<8x512xf32> -> vector<8x512xf32>
    %c0_3 = arith.constant 0 : index
    %c0_4 = arith.constant 0 : index
    %4 = vector.load %arg3[%c0_3, %c0_4] : memref<1x512xf32, #tpu.memory_space<vmem>>, vector<1x512xf32>
    %5 = vector.broadcast %4 : vector<1x512xf32> to vector<8x512xf32>
    %6 = arith.addf %3, %5 : vector<8x512xf32>
    %cst_5 = arith.constant 0.000000e+00 : f32
    %7 = vector.broadcast %cst_5 : f32 to vector<8x512xf32>
    %8 = arith.maximumf %6, %7 : vector<8x512xf32>
    %9 = arith.truncf %8 : vector<8x512xf32> to vector<8x512xbf16>
    %c0_6 = arith.constant 0 : index
    %c0_7 = arith.constant 0 : index
    %10 = vector.load %arg4[%c0_6, %c0_7] : memref<512x256xbf16, #tpu.memory_space<vmem>>, vector<512x256xbf16>
    %cst_8 = arith.constant dense<0.000000e+00> : vector<8x256xf32>
    %11 = tpu.matmul %9, %10, %cst_8 {dimension_numbers = #tpu.dot_dimension_numbers<[1], [0], [0], [1], [0, 0, 1, 1], [], []>} : vector<8x512xbf16>, vector<512x256xbf16>, vector<8x256xf32> -> vector<8x256xf32>
    %c0_9 = arith.constant 0 : index
    %c0_10 = arith.constant 0 : index
    %12 = vector.load %arg5[%c0_9, %c0_10] : memref<1x256xf32, #tpu.memory_space<vmem>>, vector<1x256xf32>
    %13 = vector.broadcast %12 : vector<1x256xf32> to vector<8x256xf32>
    %14 = arith.addf %11, %13 : vector<8x256xf32>
    %cst_11 = arith.constant 0.000000e+00 : f32
    %15 = vector.broadcast %cst_11 : f32 to vector<8x256xf32>
    %16 = arith.maximumf %14, %15 : vector<8x256xf32>
    %c0_12 = arith.constant 0 : index
    %c0_13 = arith.constant 0 : index
    %17 = vector.load %arg6[%c0_12, %c0_13] : memref<1x256xf32, #tpu.memory_space<vmem>>, vector<1x256xf32>
    %18 = vector.broadcast %17 : vector<1x256xf32> to vector<8x256xf32>
    %19 = arith.mulf %16, %18 : vector<8x256xf32>
    %cst_14 = arith.constant dense<0.000000e+00> : vector<8xf32>
    %20 = vector.multi_reduction <add>, %19, %cst_14 [1] : vector<8x256xf32> to vector<8xf32>
    %21 = vector.shape_cast %20 : vector<8xf32> to vector<8x1xf32>
    %c0_15 = arith.constant 0 : index
    %c0_16 = arith.constant 0 : index
    %22 = vector.load %arg7[%c0_15, %c0_16] : memref<1x1xf32, #tpu.memory_space<vmem>>, vector<1x1xf32>
    %23 = vector.broadcast %22 : vector<1x1xf32> to vector<8x1xf32>
    %24 = arith.addf %21, %23 : vector<8x1xf32>
    %cst_17 = arith.constant 0.000000e+00 : f32
    %25 = vector.broadcast %cst_17 : f32 to vector<8x1xf32>
    %26 = arith.subf %25, %24 : vector<8x1xf32>
    %27 = math.exp %26 : vector<8x1xf32>
    %cst_18 = arith.constant 1.000000e+00 : f32
    %28 = vector.broadcast %cst_18 : f32 to vector<8x1xf32>
    %29 = arith.addf %28, %27 : vector<8x1xf32>
    %30 = tpu.reciprocal %29 {approx = true} : vector<8x1xf32> -> vector<8x1xf32>
    %c0_19 = arith.constant 0 : index
    %c0_20 = arith.constant 0 : index
    %31 = vector.load %arg8[%c0_19, %c0_20] : memref<8x1xf32, #tpu.memory_space<vmem>>, vector<8x1xf32>
    tpu.vector_store %arg8[%c0_19, %c0_20], %30 {strides = array<i32>} : memref<8x1xf32, #tpu.memory_space<vmem>>, vector<8x1xf32>,
    return
  }
  func.func @transform_0(%arg0: i32) -> (i32, i32) {
    %c0_i32 = arith.constant 0 : i32
    %c0_i32_0 = arith.constant 0 : i32
    return %arg0, %c0_i32 : i32, i32
  }
  func.func @transform_1(%arg0: i32) -> (i32, i32) {
    %c0_i32 = arith.constant 0 : i32
    %c0_i32_0 = arith.constant 0 : i32
    %c0_i32_1 = arith.constant 0 : i32
    return %c0_i32, %c0_i32_0 : i32, i32
  }
  func.func @transform_2(%arg0: i32) -> (i32, i32) {
    %c0_i32 = arith.constant 0 : i32
    %c0_i32_0 = arith.constant 0 : i32
    %c0_i32_1 = arith.constant 0 : i32
    return %c0_i32, %c0_i32_0 : i32, i32
  }
  func.func @transform_3(%arg0: i32) -> (i32, i32) {
    %c0_i32 = arith.constant 0 : i32
    %c0_i32_0 = arith.constant 0 : i32
    %c0_i32_1 = arith.constant 0 : i32
    return %c0_i32, %c0_i32_0 : i32, i32
  }
  func.func @transform_4(%arg0: i32) -> (i32, i32) {
    %c0_i32 = arith.constant 0 : i32
    %c0_i32_0 = arith.constant 0 : i32
    %c0_i32_1 = arith.constant 0 : i32
    return %c0_i32, %c0_i32_0 : i32, i32
  }
  func.func @transform_5(%arg0: i32) -> (i32, i32) {
    %c0_i32 = arith.constant 0 : i32
    %c0_i32_0 = arith.constant 0 : i32
    %c0_i32_1 = arith.constant 0 : i32
    return %c0_i32, %c0_i32_0 : i32, i32
  }
  func.func @transform_6(%arg0: i32) -> (i32, i32) {
    %c0_i32 = arith.constant 0 : i32
    %c0_i32_0 = arith.constant 0 : i32
    %c0_i32_1 = arith.constant 0 : i32
    return %c0_i32, %c0_i32_0 : i32, i32
  }
  func.func @transform_7(%arg0: i32) -> (i32, i32) {
    %c0_i32 = arith.constant 0 : i32
    %c0_i32_0 = arith.constant 0 : i32
    return %arg0, %c0_i32 : i32, i32
  }
}

</mosaic_0001>

<bundles_post_ra>
// kernel: mnist_detector_forward.1
= control target key start
LH: loop header
LB: loop body
LE: loop exit
PB: predicated region body
PF: predicated region fallthrough
CT: control target
= control target key end

     0   :  { %s2981_s0 = inlined_call_operand.hbm [shape: f32[8,784], index: 0, kind: input, shape index: {}]   ;;  %s2982_s1 = inlined_call_operand.hbm [shape: bf16[784,512], index: 1, kind: input, shape index: {}]   ;;  %s2983_s2 = inlined_call_operand.vmem [shape: f32[1,512], index: 2, kind: input, shape index: {}]   ;;  %s2984_s3 = inlined_call_operand.hbm [shape: bf16[512,256], index: 3, kind: input, shape index: {}]   ;;  %s2985_s4 = inlined_call_operand.vmem [shape: f32[1,256], index: 4, kind: input, shape index: {}]   ;;  %s2986_s5 = inlined_call_operand.vmem [shape: f32[1,256], index: 5, kind: input, shape index: {}]   ;;  %s2987_s6 = inlined_call_operand.<no memory space> [shape: f32[1,1], index: 6, kind: input, shape index: {}]   ;;  %s2988_s7 = inlined_call_operand.vmem [shape: f32[8,1], index: 7, kind: output, shape index: {}]  }
   0x1   :  { %v12_v0 = vstv %s2987_s6 }
   0x2   :  { %13 = vst [vmem:[#allocation2] sm:$0x1] %v12_v0 }
   0x3   :  { %14 = vsyncpa [#allocation4], 0 }
   0x4   :  { %15 = vsyncpa [#allocation6], 0  ;;  %s2867_s26 = smov [#allocation5]  }
   0x5   :  { %s31_s27 = sshll.u32 %s2867_s26, 4  ;;  %s32_s27 = int_to_ptr.vmem [resolvable:$true] %s31_s27 }
   0x6   :  { %s2811_s28 = scalar_lea.vmem %s32_s27, 25088  ;;  %p2816_p1 = scmp.lt.s32.totalorder %s32_s27, %s32_s27 }
   0x7   :  { %p2812_p0 = scmp.ne.s32.totalorder %s32_s27, %s2811_s28  ;;  %p2817_p2 = scmp.lt.s32.totalorder %s2811_s28, %s2811_s28 }
   0x9   :  { %p2818_p3 = por %p2817_p2, %p2816_p1 }
   0xb   :  { %p2819_p4 = pnand %p2818_p3, %p2812_p0 }
   0xd   :  { %2822 = shalt.err (!%p2819_p4)
}
   0xe   :  { %s2868_s29 = smov 256   ;;  %s2869_s30 = smov 16  }
   0xf   :  { %37 = dma.hbm_to_vmem [thread:$0]  %s2982_s1, 25088, %s32_s27, [#allocation6], %s2868_s29, %s2868_s29, %s2869_s30  }
  0x10   :  { %s2870_s6 = smov [#allocation3]   ;;  %s2871_s11 = smov [#allocation7]  }
  0x11   :  { %s22_s10 = sshll.u32 %s2870_s6, 4  ;;  %s45_s12 = sshll.u32 %s2871_s11, 4  ;;  %s23_s10 = int_to_ptr.vmem [resolvable:$true] %s22_s10  ;;  %s46_s12 = int_to_ptr.vmem [resolvable:$true] %s45_s12 }
  0x12   :  { %s2831_s13 = scalar_lea.vmem %s23_s10, 896  ;;  %p2836_p6 = scmp.lt.s32.totalorder %s23_s10, %s23_s10 }
  0x13   :  { %p2832_p5 = scmp.ne.s32.totalorder %s23_s10, %s2831_s13  ;;  %p2837_p7 = scmp.lt.s32.totalorder %s2831_s13, %s2831_s13 }
  0x15   :  { %p2838_p8 = por %p2837_p7, %p2836_p6 }
  0x17   :  { %p2839_p9 = pnand %p2838_p8, %p2832_p5 }
  0x19   :  { %2842 = shalt.err (!%p2839_p9)
}
  0x1a   :  { %25 = dma.hbm_to_vmem [thread:$0]  %s2981_s0, 896, %s23_s10, [#allocation4]  }
  0x1b   :  { %s2851_s16 = scalar_lea.vmem %s46_s12, 8192  ;;  %p2856_p11 = scmp.lt.s32.totalorder %s46_s12, %s46_s12 }
  0x1c   :  { %p2852_p10 = scmp.ne.s32.totalorder %s46_s12, %s2851_s16  ;;  %p2857_p12 = scmp.lt.s32.totalorder %s2851_s16, %s2851_s16 }
  0x1e   :  { %p2858_p13 = por %p2857_p12, %p2856_p11 }
  0x20   :  { %p2859_p0 = pnand %p2858_p13, %p2852_p10 }
  0x22   :  { %2862 = shalt.err (!%p2859_p0)
}
  0x23   :  { %s2872_s1 = smov 128   ;;  %s2873_s17 = smov 8  }
  0x24   :  { %51 = dma.hbm_to_vmem [thread:$0]  %s2984_s3, 8192, %s46_s12, [#allocation6], %s2872_s1, %s2872_s1, %s2873_s17  }
  0x25   :  { %2863 = dma.done.wait [#allocation4], 896  }
  0x26   :  { %2864 = vsyncadd [#allocation4], 4294966400 }
  0x27   :  { %2865 = dma.done.wait [#allocation6], 33280  }
  0x28   :  { %2866 = vsyncadd [#allocation6], 4294934016  ;;  %v2409_v1 = vld [vmem:[#allocation5 + $0xe4] ss:$16 sps:$4 sm:$0xff]   ;;  %v2413_v3 = vld [vmem:[#allocation5 + $0xe0] ss:$16 sps:$4 sm:$0xff]  }
  0x29   :  { %v2411_v2 = vld [vmem:[#allocation5 + $0x2e4] ss:$16 sps:$4 sm:$0xff]   ;;  %1284 = vmatprep.subr.bf16.mxu0 %v2409_v1  ;;  %v2414_v4 = vld [vmem:[#allocation5 + $0x2e0] ss:$16 sps:$4 sm:$0xff]   ;;  %vm1280_vm0 = vcmask 130048   ;;  %vm2130_vm1 = vcmask 7168  }
  0x2a   :  { %1325 = vmatprep.subr.bf16.mxu1 %v2411_v2  ;;  %v2415_v5 = vld [vmem:[#allocation5 + $0xc4] ss:$16 sps:$4 sm:$0xff]   ;;  %1285 = vmatpush1.bf16.msra.mxu0 %v2413_v3  ;;  %v2419_v7 = vld [vmem:[#allocation5 + $0xc0] ss:$16 sps:$4 sm:$0xff]  }
  0x2b   :  { %1326 = vmatpush1.bf16.msra.mxu1 %v2414_v4  ;;  %v2417_v6 = vld [vmem:[#allocation5 + $0x2c4] ss:$16 sps:$4 sm:$0xff]   ;;  %1286 = vmatprep.subr.bf16.mxu0 %v2415_v5  ;;  %v2420_v8 = vld [vmem:[#allocation5 + $0x2c0] ss:$16 sps:$4 sm:$0xff]   ;;  %v68_v5 = vld [vmem:[#allocation3] sm:$0xff] }
  0x2c   :  { %1327 = vmatprep.subr.bf16.mxu1 %v2417_v6  ;;  %v2421_v9 = vld [vmem:[#allocation5 + $0xa4] ss:$16 sps:$4 sm:$0xff]   ;;  %v2425_v11 = vld [vmem:[#allocation5 + $0xa0] ss:$16 sps:$4 sm:$0xff]   ;;  %v70_v6 = vld [vmem:[#allocation3 + $0x10] sm:$0xff] }
  0x2d   :  { %v2423_v10 = vld [vmem:[#allocation5 + $0x2a4] ss:$16 sps:$4 sm:$0xff]   ;;  %v2426_v12 = vld [vmem:[#allocation5 + $0x2a0] ss:$16 sps:$4 sm:$0xff]  }
  0x2e   :  { %1287 = vmatpush1.bf16.msra.mxu0 %v2419_v7  ;;  %v2427_v13 = vld [vmem:[#allocation5 + $0x84] ss:$16 sps:$4 sm:$0xff]   ;;  %v2431_v15 = vld [vmem:[#allocation5 + $0x80] ss:$16 sps:$4 sm:$0xff]  }
  0x2f   :  { %1328 = vmatpush1.bf16.msra.mxu1 %v2420_v8  ;;  %1288 = vmatprep.subr.bf16.mxu0 %v2421_v9  ;;  %v2429_v14 = vld [vmem:[#allocation5 + $0x284] ss:$16 sps:$4 sm:$0xff]   ;;  %v2432_v16 = vld [vmem:[#allocation5 + $0x280] ss:$16 sps:$4 sm:$0xff]   ;;  %v2933_v9 = vpack.c.bf16 %v68_v5, %v68_v5  ;;  %v2588_v5 = vld [vmem:[#allocation5 + $0x16c] ss:$16 sps:$4 sm:$0xff]  }
  0x30   :  { %1329 = vmatprep.subr.bf16.mxu1 %v2423_v10  ;;  %v2433_v17 = vld [vmem:[#allocation5 + $0x64] ss:$16 sps:$4 sm:$0xff]   ;;  %v2437_v19 = vld [vmem:[#allocation5 + $0x60] ss:$16 sps:$4 sm:$0xff]   ;;  %v2935_v10 = vpack.c.bf16 %v70_v6, %v70_v6 }
  0x31   :  { %v2435_v18 = vld [vmem:[#allocation5 + $0x264] ss:$16 sps:$4 sm:$0xff]   ;;  %v2438_v20 = vld [vmem:[#allocation5 + $0x260] ss:$16 sps:$4 sm:$0xff]  }
  0x32   :  { %1289 = vmatpush1.bf16.msra.mxu0 %v2425_v11  ;;  %v2439_v21 = vld [vmem:[#allocation5 + $0x44] ss:$16 sps:$4 sm:$0xff]   ;;  %v2443_v23 = vld [vmem:[#allocation5 + $0x40] ss:$16 sps:$4 sm:$0xff]  }
  0x33   :  { %1330 = vmatpush1.bf16.msra.mxu1 %v2426_v12  ;;  %1290 = vmatprep.subr.bf16.mxu0 %v2427_v13  ;;  %v2441_v22 = vld [vmem:[#allocation5 + $0x244] ss:$16 sps:$4 sm:$0xff]   ;;  %v2444_v24 = vld [vmem:[#allocation5 + $0x240] ss:$16 sps:$4 sm:$0xff]  }
  0x34   :  { %1331 = vmatprep.subr.bf16.mxu1 %v2429_v14  ;;  %v2445_v25 = vld [vmem:[#allocation5 + $0x24] ss:$16 sps:$4 sm:$0xff]   ;;  %v2449_v27 = vld [vmem:[#allocation5 + $0x20] ss:$16 sps:$4 sm:$0xff]   ;;  %v2516_v14 = vld [vmem:[#allocation5 + $0xec] ss:$16 sps:$4 sm:$0xff]  }
  0x35   :  { %v2447_v26 = vld [vmem:[#allocation5 + $0x224] ss:$16 sps:$4 sm:$0xff]   ;;  %v2450_v28 = vld [vmem:[#allocation5 + $0x220] ss:$16 sps:$4 sm:$0xff]  }
  0x36   :  { %1291 = vmatpush1.bf16.msra.mxu0 %v2431_v15  ;;  %v2451_v29 = vld [vmem:[#allocation5 + $0x4] ss:$16 sps:$4 sm:$0xff]   ;;  %v2455_v31 = vld [vmem:[#allocation5] ss:$16 sps:$4 sm:$0xff]  }
  0x37   :  { %1332 = vmatpush1.bf16.msra.mxu1 %v2432_v16  ;;  %1292 = vmatprep.subr.bf16.mxu0 %v2433_v17  ;;  %v2453_v30 = vld [vmem:[#allocation5 + $0x204] ss:$16 sps:$4 sm:$0xff]   ;;  %v2456_v32 = vld [vmem:[#allocation5 + $0x200] ss:$16 sps:$4 sm:$0xff]   ;;  %v74_v16 = vld [vmem:[#allocation3 + $0x30] sm:$0xff]  ;;  %v2874_v17 = vmov 0  }
  0x38   :  { %1333 = vmatprep.subr.bf16.mxu1 %v2435_v18  ;;  %v2457_v33 = vld [vmem:[#allocation5 + $0x1e4] ss:$16 sps:$4 sm:$0xff]   ;;  %v2461_v35 = vld [vmem:[#allocation5 + $0x1e0] ss:$16 sps:$4 sm:$0xff]  }
  0x39   :  { %v2459_v34 = vld [vmem:[#allocation5 + $0x3e4] ss:$16 sps:$4 sm:$0xff]   ;;  %v2462_v36 = vld [vmem:[#allocation5 + $0x3e0] ss:$16 sps:$4 sm:$0xff]  }
  0x3a   :  { %1293 = vmatpush1.bf16.msra.mxu0 %v2437_v19  ;;  %v2463_v37 = vld [vmem:[#allocation5 + $0x1c4] ss:$16 sps:$4 sm:$0xff]   ;;  %v2467_v39 = vld [vmem:[#allocation5 + $0x1c0] ss:$16 sps:$4 sm:$0xff]   ;;  %v2514_v19 = vld [vmem:[#allocation5 + $0xe8] ss:$16 sps:$4 sm:$0xff]  }
  0x3b   :  { %1334 = vmatpush1.bf16.msra.mxu1 %v2438_v20  ;;  %1294 = vmatprep.subr.bf16.mxu0 %v2439_v21  ;;  %v2465_v38 = vld [vmem:[#allocation5 + $0x3c4] ss:$16 sps:$4 sm:$0xff]   ;;  %v2468_v40 = vld [vmem:[#allocation5 + $0x3c0] ss:$16 sps:$4 sm:$0xff]   ;;  %v2940_v20 = vpack.c.bf16 %v74_v16, %v74_v16  ;;  %v72_v16 = vld [vmem:[#allocation3 + $0x20] sm:$0xff] }
  0x3c   :  { %1335 = vmatprep.subr.bf16.mxu1 %v2441_v22  ;;  %v2469_v41 = vld [vmem:[#allocation5 + $0x1a4] ss:$16 sps:$4 sm:$0xff]   ;;  %v2473_v43 = vld [vmem:[#allocation5 + $0x1a0] ss:$16 sps:$4 sm:$0xff]   ;;  %v2522_v22 = vld [vmem:[#allocation5 + $0xcc] ss:$16 sps:$4 sm:$0xff]  }
  0x3d   :  { %v2471_v42 = vld [vmem:[#allocation5 + $0x3a4] ss:$16 sps:$4 sm:$0xff]   ;;  %v2474_v44 = vld [vmem:[#allocation5 + $0x3a0] ss:$16 sps:$4 sm:$0xff]  }
  0x3e   :  { %1295 = vmatpush1.bf16.msra.mxu0 %v2443_v23  ;;  %v2475_v45 = vld [vmem:[#allocation5 + $0x184] ss:$16 sps:$4 sm:$0xff]   ;;  %v2479_v48 = vld [vmem:[#allocation5 + $0x180] ss:$16 sps:$4 sm:$0xff]  }
  0x3f   :  { %1336 = vmatpush1.bf16.msra.mxu1 %v2444_v24  ;;  %1296 = vmatprep.subr.bf16.mxu0 %v2445_v25  ;;  %v2477_v46 = vld [vmem:[#allocation5 + $0x384] ss:$16 sps:$4 sm:$0xff]   ;;  %v2480_v49 = vld [vmem:[#allocation5 + $0x380] ss:$16 sps:$4 sm:$0xff]   ;;  %v2520_v24 = vld [vmem:[#allocation5 + $0xc8] ss:$16 sps:$4 sm:$0xff]  }
  0x40   :  { %1337 = vmatprep.subr.bf16.mxu1 %v2447_v26  ;;  %v69_v47 = vld [vmem:[#allocation3 + $0x8] sm:$0xff]  ;;  %v71_v51 = vld [vmem:[#allocation3 + $0x18] sm:$0xff]  ;;  %v2528_v26 = vld [vmem:[#allocation5 + $0xac] ss:$16 sps:$4 sm:$0xff]  }
  0x41   :  { %v2927_v50 = vpack.c.bf16 %v69_v47, %v69_v47  ;;  %v2481_v52 = vld [vmem:[#allocation5 + $0x164] ss:$16 sps:$4 sm:$0xff]   ;;  %v2929_v53 = vpack.c.bf16 %v71_v51, %v71_v51  ;;  %v2485_v55 = vld [vmem:[#allocation5 + $0x160] ss:$16 sps:$4 sm:$0xff]  }
  0x42   :  { %1297 = vmatpush1.bf16.msra.mxu0 %v2449_v27  ;;  %v2483_v54 = vld [vmem:[#allocation5 + $0x364] ss:$16 sps:$4 sm:$0xff]   ;;  %v2486_v56 = vld [vmem:[#allocation5 + $0x360] ss:$16 sps:$4 sm:$0xff]  }
  0x43   :  { %1338 = vmatpush1.bf16.msra.mxu1 %v2450_v28  ;;  %1298 = vmatprep.subr.bf16.mxu0 %v2451_v29  ;;  %v2487_v57 = vld [vmem:[#allocation5 + $0x144] ss:$16 sps:$4 sm:$0xff]   ;;  %v2491_v59 = vld [vmem:[#allocation5 + $0x140] ss:$16 sps:$4 sm:$0xff]   ;;  %v2526_v28 = vld [vmem:[#allocation5 + $0xa8] ss:$16 sps:$4 sm:$0xff]  }
  0x44   :  { %1339 = vmatprep.subr.bf16.mxu1 %v2453_v30  ;;  %1316 = vmatprep.mubr.bf16.mxu0 %v2927_v50  ;;  %v2489_v58 = vld [vmem:[#allocation5 + $0x344] ss:$16 sps:$4 sm:$0xff]   ;;  %v2492_v60 = vld [vmem:[#allocation5 + $0x340] ss:$16 sps:$4 sm:$0xff]   ;;  %v2534_v30 = vld [vmem:[#allocation5 + $0x8c] ss:$16 sps:$4 sm:$0xff]  }
  0x45   :  { %1357 = vmatprep.mubr.bf16.mxu1 %v2929_v53  ;;  %v2493_v61 = vld [vmem:[#allocation5 + $0x124] ss:$16 sps:$4 sm:$0xff]   ;;  %v2497_v63 = vld [vmem:[#allocation5 + $0x120] ss:$16 sps:$4 sm:$0xff]  }
  0x46   :  { %1299 = vmatpush1.bf16.msra.mxu0 %v2455_v31  ;;  %v2495_v62 = vld [vmem:[#allocation5 + $0x324] ss:$16 sps:$4 sm:$0xff]   ;;  %v2498_v0 = vld [vmem:[#allocation5 + $0x320] ss:$16 sps:$4 sm:$0xff]  }
  0x47   :  { %1340 = vmatpush1.bf16.msra.mxu1 %v2456_v32  ;;  %1300 = vmatprep.subr.bf16.mxu0 %v2457_v33  ;;  %v2499_v1 = vld [vmem:[#allocation5 + $0x104] ss:$16 sps:$4 sm:$0xff]   ;;  %v2503_v3 = vld [vmem:[#allocation5 + $0x100] ss:$16 sps:$4 sm:$0xff]   ;;  %v2532_v32 = vld [vmem:[#allocation5 + $0x88] ss:$16 sps:$4 sm:$0xff]  }
  0x48   :  { %1341 = vmatprep.subr.bf16.mxu1 %v2459_v34  ;;  %v2501_v2 = vld [vmem:[#allocation5 + $0x304] ss:$16 sps:$4 sm:$0xff]   ;;  %v2504_v4 = vld [vmem:[#allocation5 + $0x300] ss:$16 sps:$4 sm:$0xff]   ;;  %v2540_v34 = vld [vmem:[#allocation5 + $0x6c] ss:$16 sps:$4 sm:$0xff]  }
  0x49   :  { %v2507_v7 = vld [vmem:[#allocation5 + $0x4e4] ss:$16 sps:$4 sm:$0xff]   ;;  %v2505_v11 = vld [vmem:[#allocation5 + $0x4e0] ss:$16 sps:$4 sm:$0xff]  }
  0x4a   :  { %1301 = vmatpush2.bf16.msra.mxu0 %v2461_v35  ;;  %v2510_v8 = vld [vmem:[#allocation5 + $0x604] ss:$16 sps:$4 sm:$0xff]   ;;  %v2508_v12 = vld [vmem:[#allocation5 + $0x600] ss:$16 sps:$4 sm:$0xff]  }
  0x4b   :  { %1342 = vmatpush2.bf16.msra.mxu1 %v2462_v36  ;;  %1302 = vmatprep.subr.bf16.mxu0 %v2463_v37  ;;  %v2513_v13 = vld [vmem:[#allocation5 + $0x4c4] ss:$16 sps:$4 sm:$0xff]   ;;  %v2511_v15 = vld [vmem:[#allocation5 + $0x4c0] ss:$16 sps:$4 sm:$0xff]  }
  0x4c   :  { %1343 = vmatprep.subr.bf16.mxu1 %v2465_v38  ;;  %v2519_v18 = vld [vmem:[#allocation5 + $0x4a4] ss:$16 sps:$4 sm:$0xff]   ;;  %v2517_v21 = vld [vmem:[#allocation5 + $0x4a0] ss:$16 sps:$4 sm:$0xff]   ;;  %v2538_v38 = vld [vmem:[#allocation5 + $0x68] ss:$16 sps:$4 sm:$0xff]  }
  0x4d   :  { %v2525_v23 = vld [vmem:[#allocation5 + $0x484] ss:$16 sps:$4 sm:$0xff]   ;;  %v2523_v25 = vld [vmem:[#allocation5 + $0x480] ss:$16 sps:$4 sm:$0xff]  }
  0x4e   :  { %1303 = vmatpush2.bf16.msra.mxu0 %v2467_v39  ;;  %v2531_v27 = vld [vmem:[#allocation5 + $0x464] ss:$16 sps:$4 sm:$0xff]   ;;  %v2529_v29 = vld [vmem:[#allocation5 + $0x460] ss:$16 sps:$4 sm:$0xff]  }
  0x4f   :  { %1344 = vmatpush2.bf16.msra.mxu1 %v2468_v40  ;;  %1304 = vmatprep.subr.bf16.mxu0 %v2469_v41  ;;  %v2537_v31 = vld [vmem:[#allocation5 + $0x444] ss:$16 sps:$4 sm:$0xff]   ;;  %v2535_v33 = vld [vmem:[#allocation5 + $0x440] ss:$16 sps:$4 sm:$0xff]   ;;  %v2546_v40 = vld [vmem:[#allocation5 + $0x4c] ss:$16 sps:$4 sm:$0xff]  }
  0x50   :  { %1345 = vmatprep.subr.bf16.mxu1 %v2471_v42  ;;  %v2543_v35 = vld [vmem:[#allocation5 + $0x424] ss:$16 sps:$4 sm:$0xff]   ;;  %v2541_v39 = vld [vmem:[#allocation5 + $0x420] ss:$16 sps:$4 sm:$0xff]   ;;  %v2544_v42 = vld [vmem:[#allocation5 + $0x48] ss:$16 sps:$4 sm:$0xff]  }
  0x51   :  { %v73_v36 = vld [vmem:[#allocation3 + $0x28] sm:$0xff] }
  0x52   :  { %1305 = vmatpush2.bf16.msra.mxu0 %v2473_v43  ;;  %v2945_v37 = vpack.c.bf16 %v73_v36, %v73_v36  ;;  %v2549_v41 = vld [vmem:[#allocation5 + $0x404] ss:$16 sps:$4 sm:$0xff]   ;;  %v2547_v43 = vld [vmem:[#allocation5 + $0x400] ss:$16 sps:$4 sm:$0xff]   ;;  %v2627_v36 = vld [vmem:[#allocation5 + $0x26c] ss:$16 sps:$4 sm:$0xff]  }
  0x53   :  { %1346 = vmatpush2.bf16.msra.mxu1 %v2474_v44  ;;  %1306 = vmatprep.subr.bf16.mxu0 %v2475_v45  ;;  %v2552_v44 = vld [vmem:[#allocation5 + $0x2c] ss:$16 sps:$4 sm:$0xff]   ;;  %v2555_v45 = vld [vmem:[#allocation5 + $0x5e4] ss:$16 sps:$4 sm:$0xff]   ;;  %v2553_v47 = vld [vmem:[#allocation5 + $0x5e0] ss:$16 sps:$4 sm:$0xff]  }
  0x54   :  { %1347 = vmatprep.subr.bf16.mxu1 %v2477_v46  ;;  %v2550_v46 = vld [vmem:[#allocation5 + $0x28] ss:$16 sps:$4 sm:$0xff]   ;;  %v2559_v51 = vld [vmem:[#allocation5 + $0x5c0] ss:$16 sps:$4 sm:$0xff]   ;;  %v2591_v6 = vld [vmem:[#allocation5 + $0x524] ss:$16 sps:$4 sm:$0xff]  }
  0x56   :  { %1307 = vmatpush2.bf16.msra.mxu0 %v2479_v48  ;;  %v2558_v48 = vld [vmem:[#allocation5 + $0xc] ss:$16 sps:$4 sm:$0xff]  }
  0x57   :  { %1348 = vmatpush2.bf16.msra.mxu1 %v2480_v49  ;;  %1308 = vmatprep.subr.bf16.mxu0 %v2481_v52  ;;  %v2561_v49 = vld [vmem:[#allocation5 + $0x5c4] ss:$16 sps:$4 sm:$0xff]   ;;  %v2564_v52 = vld [vmem:[#allocation5 + $0x1ec] ss:$16 sps:$4 sm:$0xff]  }
  0x58   :  { %1349 = vmatprep.subr.bf16.mxu1 %v2483_v54  ;;  %v2567_v54 = vld [vmem:[#allocation5 + $0x5a4] ss:$16 sps:$4 sm:$0xff]  }
  0x5a   :  { %1309 = vmatpush2.bf16.msra.mxu0 %v2485_v55  ;;  %v2562_v55 = vld [vmem:[#allocation5 + $0x1e8] ss:$16 sps:$4 sm:$0xff]  }
  0x5b   :  { %1350 = vmatpush2.bf16.msra.mxu1 %v2486_v56  ;;  %1310 = vmatprep.subr.bf16.mxu0 %v2487_v57  ;;  %v2565_v56 = vld [vmem:[#allocation5 + $0x5a0] ss:$16 sps:$4 sm:$0xff]   ;;  %v2570_v57 = vld [vmem:[#allocation5 + $0x1cc] ss:$16 sps:$4 sm:$0xff]  }
  0x5c   :  { %1351 = vmatprep.subr.bf16.mxu1 %v2489_v58  ;;  %v2573_v58 = vld [vmem:[#allocation5 + $0x584] ss:$16 sps:$4 sm:$0xff]  }
  0x5e   :  { %1311 = vmatpush2.bf16.msra.mxu0 %v2491_v59  ;;  %v2568_v59 = vld [vmem:[#allocation5 + $0x1c8] ss:$16 sps:$4 sm:$0xff]  }
  0x5f   :  { %1352 = vmatpush2.bf16.msra.mxu1 %v2492_v60  ;;  %1312 = vmatprep.subr.bf16.mxu0 %v2493_v61  ;;  %v2571_v60 = vld [vmem:[#allocation5 + $0x580] ss:$16 sps:$4 sm:$0xff]   ;;  %v2576_v61 = vld [vmem:[#allocation5 + $0x1ac] ss:$16 sps:$4 sm:$0xff]  }
  0x60   :  { %1353 = vmatprep.subr.bf16.mxu1 %v2495_v62  ;;  %v2579_v62 = vld [vmem:[#allocation5 + $0x564] ss:$16 sps:$4 sm:$0xff]  }
  0x62   :  { %1313 = vmatpush2.bf16.msra.mxu0 %v2497_v63  ;;  %v2574_v63 = vld [vmem:[#allocation5 + $0x1a8] ss:$16 sps:$4 sm:$0xff]  }
  0x63   :  { %1354 = vmatpush2.bf16.msra.mxu1 %v2498_v0  ;;  %1314 = vmatprep.subr.bf16.mxu0 %v2499_v1  ;;  %v2577_v0 = vld [vmem:[#allocation5 + $0x560] ss:$16 sps:$4 sm:$0xff]   ;;  %v2582_v1 = vld [vmem:[#allocation5 + $0x18c] ss:$16 sps:$4 sm:$0xff]  }
  0x64   :  { %1355 = vmatprep.subr.bf16.mxu1 %v2501_v2  ;;  %v2585_v2 = vld [vmem:[#allocation5 + $0x544] ss:$16 sps:$4 sm:$0xff]  }
  0x66   :  { %1315 = vmatpush2.bf16.msra.mxu0 %v2503_v3  ;;  %v2580_v3 = vld [vmem:[#allocation5 + $0x188] ss:$16 sps:$4 sm:$0xff]  }
  0x67   :  { %1356 = vmatpush2.bf16.msra.mxu1 %v2504_v4  ;;  %1366 = vmatprep.subr.bf16.mxu0 %v2507_v7  ;;  %v2583_v4 = vld [vmem:[#allocation5 + $0x540] ss:$16 sps:$4 sm:$0xff]   ;;  %v2586_v7 = vld [vmem:[#allocation5 + $0x168] ss:$16 sps:$4 sm:$0xff]  }
  0x68   :  { %1421 = vmatprep.subr.bf16.mxu1 %v2510_v8  ;;  %v2589_v8 = vld [vmem:[#allocation5 + $0x520] ss:$16 sps:$4 sm:$0xff]  }
  0x69   :  { %1317 = vmatmul.mubr.bf16.vlgmr.msra.gmra.mxu0 %v2933_v9 }
  0x6a   :  { %1358 = vmatmul.mubr.bf16.vlgmr.msra.gmra.mxu1 %v2935_v10  ;;  %1367 = vmatpush1.bf16.msra.mxu0 %v2505_v11  ;;  %v2594_v11 = vld [vmem:[#allocation5 + $0x14c] ss:$16 sps:$4 sm:$0xff]  }
  0x6b   :  { %1422 = vmatpush1.bf16.msra.mxu1 %v2508_v12  ;;  %1368 = vmatprep.subr.bf16.mxu0 %v2513_v13  ;;  %v2597_v12 = vld [vmem:[#allocation5 + $0x504] ss:$16 sps:$4 sm:$0xff]   ;;  %v2592_v13 = vld [vmem:[#allocation5 + $0x148] ss:$16 sps:$4 sm:$0xff]  }
  0x6c   :  { %1439 = vmatprep.mubr.bf16.mxu1 %v2874_v17  ;;  %1448 = vmatprep.subr.bf16.mxu1 %v2516_v14  ;;  %v2595_v14 = vld [vmem:[#allocation5 + $0x500] ss:$16 sps:$4 sm:$0xff]  }
  0x6d   :  { %1398 = vmatprep.mubr.bf16.mxu0 %v2945_v37 }
  0x6e   :  { %1369 = vmatpush1.bf16.msra.mxu0 %v2511_v15  ;;  %v2600_v15 = vld [vmem:[#allocation5 + $0x12c] ss:$16 sps:$4 sm:$0xff]  }
  0x6f   :  { %1370 = vmatprep.subr.bf16.mxu0 %v2519_v18  ;;  %v2603_v18 = vld [vmem:[#allocation5 + $0x2ec] ss:$16 sps:$4 sm:$0xff]  }
  0x72   :  { %2334 = vmatmul.mubr.msk.bf16.vlgmr.msra.gmra.mxu1 %vm1280_vm0, %v2940_v20  ;;  %1371 = vmatpush1.bf16.msra.mxu0 %v2517_v21  ;;  %v2948_v21 = vpack.c.bf16 %v72_v16, %v72_v16  ;;  %v2690_v16 = vld [vmem:[#allocation5 + $0x54c] ss:$16 sps:$4 sm:$0xff]  }
  0x73   :  { %1449 = vmatpush1.bf16.msra.mxu1 %v2514_v19  ;;  %1372 = vmatprep.subr.bf16.mxu0 %v2525_v23  ;;  %v2598_v19 = vld [vmem:[#allocation5 + $0x128] ss:$16 sps:$4 sm:$0xff]   ;;  %v2606_v23 = vld [vmem:[#allocation5 + $0x10c] ss:$16 sps:$4 sm:$0xff]  }
  0x74   :  { %1450 = vmatprep.subr.bf16.mxu1 %v2522_v22  ;;  %1480 = vmatprep.mubr.bf16.mxu1 %v2927_v50  ;;  %v2556_v50 = vld [vmem:[#allocation5 + $0x8] ss:$16 sps:$4 sm:$0xff]  }
  0x75   :  { %v2601_v22 = vld [vmem:[#allocation5 + $0x2e8] ss:$16 sps:$4 sm:$0xff]  }
  0x76   :  { %1373 = vmatpush1.bf16.msra.mxu0 %v2523_v25  ;;  %v2604_v25 = vld [vmem:[#allocation5 + $0x108] ss:$16 sps:$4 sm:$0xff]  }
  0x77   :  { %1451 = vmatpush1.bf16.msra.mxu1 %v2520_v24  ;;  %1374 = vmatprep.subr.bf16.mxu0 %v2531_v27  ;;  %v2609_v24 = vld [vmem:[#allocation5 + $0x2cc] ss:$16 sps:$4 sm:$0xff]  }
  0x78   :  { %1452 = vmatprep.subr.bf16.mxu1 %v2528_v26  ;;  %v2607_v26 = vld [vmem:[#allocation5 + $0x2c8] ss:$16 sps:$4 sm:$0xff]   ;;  %v2612_v27 = vld [vmem:[#allocation5 + $0x4ec] ss:$16 sps:$4 sm:$0xff]  }
  0x7a   :  { %1375 = vmatpush1.bf16.msra.mxu0 %v2529_v29  ;;  %v2610_v29 = vld [vmem:[#allocation5 + $0x4e8] ss:$16 sps:$4 sm:$0xff]  }
  0x7b   :  { %1453 = vmatpush1.bf16.msra.mxu1 %v2526_v28  ;;  %1376 = vmatprep.subr.bf16.mxu0 %v2537_v31  ;;  %v2615_v28 = vld [vmem:[#allocation5 + $0x2ac] ss:$16 sps:$4 sm:$0xff]  }
  0x7c   :  { %1454 = vmatprep.subr.bf16.mxu1 %v2534_v30  ;;  %v2613_v30 = vld [vmem:[#allocation5 + $0x2a8] ss:$16 sps:$4 sm:$0xff]   ;;  %v2618_v31 = vld [vmem:[#allocation5 + $0x4cc] ss:$16 sps:$4 sm:$0xff]  }
  0x7e   :  { %1377 = vmatpush1.bf16.msra.mxu0 %v2535_v33  ;;  %v2616_v33 = vld [vmem:[#allocation5 + $0x4c8] ss:$16 sps:$4 sm:$0xff]  }
  0x7f   :  { %1455 = vmatpush1.bf16.msra.mxu1 %v2532_v32  ;;  %1378 = vmatprep.subr.bf16.mxu0 %v2543_v35  ;;  %v2621_v32 = vld [vmem:[#allocation5 + $0x28c] ss:$16 sps:$4 sm:$0xff]  }
  0x80   :  { %1456 = vmatprep.subr.bf16.mxu1 %v2540_v34  ;;  %v2619_v34 = vld [vmem:[#allocation5 + $0x288] ss:$16 sps:$4 sm:$0xff]   ;;  %v2624_v35 = vld [vmem:[#allocation5 + $0x4ac] ss:$16 sps:$4 sm:$0xff]  }
  0x82   :  { %1379 = vmatpush1.bf16.msra.mxu0 %v2541_v39  ;;  %v2630_v39 = vld [vmem:[#allocation5 + $0x48c] ss:$16 sps:$4 sm:$0xff]  }
  0x83   :  { %1457 = vmatpush1.bf16.msra.mxu1 %v2538_v38  ;;  %1380 = vmatprep.subr.bf16.mxu0 %v2549_v41  ;;  %v2622_v38 = vld [vmem:[#allocation5 + $0x4a8] ss:$16 sps:$4 sm:$0xff]  }
  0x84   :  { %1458 = vmatprep.subr.bf16.mxu1 %v2546_v40  ;;  %v2633_v40 = vld [vmem:[#allocation5 + $0x24c] ss:$16 sps:$4 sm:$0xff]   ;;  %v2628_v41 = vld [vmem:[#allocation5 + $0x488] ss:$16 sps:$4 sm:$0xff]  }
  0x86   :  { %1381 = vmatpush1.bf16.msra.mxu0 %v2547_v43  ;;  %v2639_v43 = vld [vmem:[#allocation5 + $0x22c] ss:$16 sps:$4 sm:$0xff]  }
  0x87   :  { %1459 = vmatpush1.bf16.msra.mxu1 %v2544_v42  ;;  %1382 = vmatprep.subr.bf16.mxu0 %v2555_v45  ;;  %v2636_v42 = vld [vmem:[#allocation5 + $0x46c] ss:$16 sps:$4 sm:$0xff]   ;;  %v2637_v45 = vld [vmem:[#allocation5 + $0x228] ss:$16 sps:$4 sm:$0xff]  }
  0x88   :  { %1460 = vmatprep.subr.bf16.mxu1 %v2552_v44  ;;  %v2634_v44 = vld [vmem:[#allocation5 + $0x468] ss:$16 sps:$4 sm:$0xff]  }
  0x8a   :  { %1383 = vmatpush2.bf16.msra.mxu0 %v2553_v47  ;;  %v2640_v47 = vld [vmem:[#allocation5 + $0x448] ss:$16 sps:$4 sm:$0xff]  }
  0x8b   :  { %1461 = vmatpush1.bf16.msra.mxu1 %v2550_v46  ;;  %1384 = vmatprep.subr.bf16.mxu0 %v2561_v49  ;;  %v2645_v46 = vld [vmem:[#allocation5 + $0x20c] ss:$16 sps:$4 sm:$0xff]  }
  0x8c   :  { %1462 = vmatprep.subr.bf16.mxu1 %v2558_v48  ;;  %v2643_v48 = vld [vmem:[#allocation5 + $0x208] ss:$16 sps:$4 sm:$0xff]   ;;  %v2648_v49 = vld [vmem:[#allocation5 + $0x42c] ss:$16 sps:$4 sm:$0xff]  }
  0x8e   :  { %1385 = vmatpush2.bf16.msra.mxu0 %v2559_v51  ;;  %v2646_v51 = vld [vmem:[#allocation5 + $0x428] ss:$16 sps:$4 sm:$0xff]  }
  0x8f   :  { %1463 = vmatpush1.bf16.msra.mxu1 %v2556_v50  ;;  %1386 = vmatprep.subr.bf16.mxu0 %v2567_v54  ;;  %v2651_v50 = vld [vmem:[#allocation5 + $0x3ec] ss:$16 sps:$4 sm:$0xff]  }
  0x90   :  { %1464 = vmatprep.subr.bf16.mxu1 %v2564_v52  ;;  %v2649_v52 = vld [vmem:[#allocation5 + $0x3e8] ss:$16 sps:$4 sm:$0xff]   ;;  %v2654_v54 = vld [vmem:[#allocation5 + $0x40c] ss:$16 sps:$4 sm:$0xff]  }
  0x92   :  { %1387 = vmatpush2.bf16.msra.mxu0 %v2565_v56  ;;  %v2652_v56 = vld [vmem:[#allocation5 + $0x408] ss:$16 sps:$4 sm:$0xff]  }
  0x93   :  { %1465 = vmatpush2.bf16.msra.mxu1 %v2562_v55  ;;  %1388 = vmatprep.subr.bf16.mxu0 %v2573_v58  ;;  %v2657_v55 = vld [vmem:[#allocation5 + $0x3cc] ss:$16 sps:$4 sm:$0xff]  }
  0x94   :  { %1466 = vmatprep.subr.bf16.mxu1 %v2570_v57  ;;  %v2655_v57 = vld [vmem:[#allocation5 + $0x3c8] ss:$16 sps:$4 sm:$0xff]   ;;  %v2660_v58 = vld [vmem:[#allocation5 + $0x5ec] ss:$16 sps:$4 sm:$0xff]  }
  0x96   :  { %1389 = vmatpush2.bf16.msra.mxu0 %v2571_v60  ;;  %v2658_v60 = vld [vmem:[#allocation5 + $0x5e8] ss:$16 sps:$4 sm:$0xff]  }
  0x97   :  { %1467 = vmatpush2.bf16.msra.mxu1 %v2568_v59  ;;  %1390 = vmatprep.subr.bf16.mxu0 %v2579_v62  ;;  %v2663_v59 = vld [vmem:[#allocation5 + $0x3ac] ss:$16 sps:$4 sm:$0xff]  }
  0x98   :  { %1468 = vmatprep.subr.bf16.mxu1 %v2576_v61  ;;  %v2661_v61 = vld [vmem:[#allocation5 + $0x3a8] ss:$16 sps:$4 sm:$0xff]   ;;  %v2666_v62 = vld [vmem:[#allocation5 + $0x5cc] ss:$16 sps:$4 sm:$0xff]  }
  0x9a   :  { %1391 = vmatpush2.bf16.msra.mxu0 %v2577_v0  ;;  %v2664_v0 = vld [vmem:[#allocation5 + $0x5c8] ss:$16 sps:$4 sm:$0xff]  }
  0x9b   :  { %1469 = vmatpush2.bf16.msra.mxu1 %v2574_v63  ;;  %1392 = vmatprep.subr.bf16.mxu0 %v2585_v2  ;;  %v2669_v63 = vld [vmem:[#allocation5 + $0x38c] ss:$16 sps:$4 sm:$0xff]  }
  0x9c   :  { %1470 = vmatprep.subr.bf16.mxu1 %v2582_v1  ;;  %v2667_v1 = vld [vmem:[#allocation5 + $0x388] ss:$16 sps:$4 sm:$0xff]   ;;  %v2672_v2 = vld [vmem:[#allocation5 + $0x5ac] ss:$16 sps:$4 sm:$0xff]  }
  0x9e   :  { %1393 = vmatpush2.bf16.msra.mxu0 %v2583_v4  ;;  %v2670_v4 = vld [vmem:[#allocation5 + $0x5a8] ss:$16 sps:$4 sm:$0xff]  }
  0x9f   :  { %1471 = vmatpush2.bf16.msra.mxu1 %v2580_v3  ;;  %1394 = vmatprep.subr.bf16.mxu0 %v2591_v6  ;;  %v2675_v3 = vld [vmem:[#allocation5 + $0x36c] ss:$16 sps:$4 sm:$0xff]  }
  0xa0   :  { %1472 = vmatprep.subr.bf16.mxu1 %v2588_v5  ;;  %v2673_v5 = vld [vmem:[#allocation5 + $0x368] ss:$16 sps:$4 sm:$0xff]   ;;  %v2678_v6 = vld [vmem:[#allocation5 + $0x58c] ss:$16 sps:$4 sm:$0xff]  }
  0xa2   :  { %1395 = vmatpush2.bf16.msra.mxu0 %v2589_v8  ;;  %v2676_v8 = vld [vmem:[#allocation5 + $0x588] ss:$16 sps:$4 sm:$0xff]  }
  0xa3   :  { %1473 = vmatpush2.bf16.msra.mxu1 %v2586_v7  ;;  %1396 = vmatprep.subr.bf16.mxu0 %v2597_v12  ;;  %v2681_v7 = vld [vmem:[#allocation5 + $0x34c] ss:$16 sps:$4 sm:$0xff]  }
  0xa4   :  { %1474 = vmatprep.subr.bf16.mxu1 %v2594_v11  ;;  %v2679_v11 = vld [vmem:[#allocation5 + $0x348] ss:$16 sps:$4 sm:$0xff]   ;;  %v2684_v12 = vld [vmem:[#allocation5 + $0x56c] ss:$16 sps:$4 sm:$0xff]  }
  0xa6   :  { %1397 = vmatpush2.bf16.msra.mxu0 %v2595_v14  ;;  %v2682_v14 = vld [vmem:[#allocation5 + $0x568] ss:$16 sps:$4 sm:$0xff]  }
  0xa7   :  { %1475 = vmatpush2.bf16.msra.mxu1 %v2592_v13  ;;  %1489 = vmatprep.subr.bf16.mxu0 %v2603_v18  ;;  %v2687_v13 = vld [vmem:[#allocation5 + $0x32c] ss:$16 sps:$4 sm:$0xff]  }
  0xa8   :  { %1476 = vmatprep.subr.bf16.mxu1 %v2600_v15  ;;  %v2685_v15 = vld [vmem:[#allocation5 + $0x328] ss:$16 sps:$4 sm:$0xff]   ;;  %v2693_v18 = vld [vmem:[#allocation5 + $0x30c] ss:$16 sps:$4 sm:$0xff]  }
  0xa9   :  { %1399 = vmatmul.mubr.bf16.vlgmr.msra.gmra.mxu0 %v2948_v21 }
  0xaa   :  { %1490 = vmatpush1.bf16.msra.mxu0 %v2601_v22  ;;  %1521 = vmatprep.mubr.bf16.mxu0 %v2929_v53  ;;  %v2625_v53 = vld [vmem:[#allocation5 + $0x268] ss:$16 sps:$4 sm:$0xff]  }
  0xab   :  { %1477 = vmatpush2.bf16.msra.mxu1 %v2598_v19  ;;  %1491 = vmatprep.subr.bf16.mxu0 %v2609_v24  ;;  %v2688_v19 = vld [vmem:[#allocation5 + $0x548] ss:$16 sps:$4 sm:$0xff]   ;;  %v2699_v24 = vld [vmem:[#allocation5 + $0x60c] ss:$16 sps:$4 sm:$0xff]  }
  0xac   :  { %1478 = vmatprep.subr.bf16.mxu1 %v2606_v23  ;;  %v2691_v22 = vld [vmem:[#allocation5 + $0x308] ss:$16 sps:$4 sm:$0xff]   ;;  %v2696_v23 = vld [vmem:[#allocation5 + $0x52c] ss:$16 sps:$4 sm:$0xff]  }
  0xae   :  { %1492 = vmatpush1.bf16.msra.mxu0 %v2607_v26  ;;  %v2697_v26 = vld [vmem:[#allocation5 + $0x608] ss:$16 sps:$4 sm:$0xff]  }
  0xaf   :  { %1479 = vmatpush2.bf16.msra.mxu1 %v2604_v25  ;;  %1493 = vmatprep.subr.bf16.mxu0 %v2615_v28  ;;  %v2694_v25 = vld [vmem:[#allocation5 + $0x528] ss:$16 sps:$4 sm:$0xff]   ;;  %v2705_v28 = vld [vmem:[#allocation7 + $0x74] ss:$8 sps:$4 sm:$0xff]  }
  0xb0   :  { %1530 = vmatprep.subr.bf16.mxu1 %v2612_v27  ;;  %v2702_v27 = vld [vmem:[#allocation5 + $0x50c] ss:$16 sps:$4 sm:$0xff]  }
  0xb2   :  { %1481 = vmatmul.mubr.bf16.vlgmr.msra.gmra.mxu1 %v2933_v9  ;;  %1494 = vmatpush1.bf16.msra.mxu0 %v2613_v30  ;;  %v2631_v9 = vld [vmem:[#allocation5 + $0x248] ss:$16 sps:$4 sm:$0xff]  }
  0xb3   :  { %1531 = vmatpush1.bf16.msra.mxu1 %v2610_v29  ;;  %1495 = vmatprep.subr.bf16.mxu0 %v2621_v32  ;;  %v2700_v29 = vld [vmem:[#allocation5 + $0x508] ss:$16 sps:$4 sm:$0xff]  }
  0xb4   :  { %1532 = vmatprep.subr.bf16.mxu1 %v2618_v31  ;;  %1562 = vmatprep.mubr.bf16.mxu1 %v2945_v37  ;;  %v2642_v37 = vld [vmem:[#allocation5 + $0x44c] ss:$16 sps:$4 sm:$0xff]   ;;  %v2703_v30 = vld [vmem:[#allocation7 + $0x70] ss:$8 sps:$4 sm:$0xff]   ;;  %v2706_v32 = vld [vmem:[#allocation7 + $0x60] ss:$8 sps:$4 sm:$0xff]  }
  0xb5   :  { %v2708_v31 = vld [vmem:[#allocation7 + $0x64] ss:$8 sps:$4 sm:$0xff]  }
  0xb6   :  { %1496 = vmatpush1.bf16.msra.mxu0 %v2619_v34  ;;  %v2714_v34 = vld [vmem:[#allocation7 + $0x44] ss:$8 sps:$4 sm:$0xff]  }
  0xb7   :  { %1533 = vmatpush1.bf16.msra.mxu1 %v2616_v33  ;;  %1497 = vmatprep.subr.bf16.mxu0 %v2627_v36  ;;  %v2711_v33 = vld [vmem:[#allocation7 + $0x54] ss:$8 sps:$4 sm:$0xff]  }
  0xb8   :  { %1534 = vmatprep.subr.bf16.mxu1 %v2624_v35  ;;  %v2751_v35 = vld [vmem:[#allocation7 + $0x170] ss:$8 sps:$4 sm:$0xff]   ;;  %v2753_v36 = vld [vmem:[#allocation7 + $0x174] ss:$8 sps:$4 sm:$0xff]  }
  0xba   :  { %1498 = vmatpush1.bf16.msra.mxu0 %v2625_v53  ;;  %v2754_v53 = vld [vmem:[#allocation7 + $0x160] ss:$8 sps:$4 sm:$0xff]  }
  0xbb   :  { %1535 = vmatpush1.bf16.msra.mxu1 %v2622_v38  ;;  %1499 = vmatprep.subr.bf16.mxu0 %v2633_v40  ;;  %v2712_v38 = vld [vmem:[#allocation7 + $0x40] ss:$8 sps:$4 sm:$0xff]   ;;  %v2757_v40 = vld [vmem:[#allocation7 + $0x150] ss:$8 sps:$4 sm:$0xff]  }
  0xbc   :  { %1536 = vmatprep.subr.bf16.mxu1 %v2630_v39  ;;  %v2715_v39 = vld [vmem:[#allocation7 + $0x30] ss:$8 sps:$4 sm:$0xff]  }
  0xbe   :  { %1500 = vmatpush1.bf16.msra.mxu0 %v2631_v9  ;;  %v2762_v9 = vld [vmem:[#allocation7 + $0x144] ss:$8 sps:$4 sm:$0xff]  }
  0xbf   :  { %1537 = vmatpush1.bf16.msra.mxu1 %v2628_v41  ;;  %1501 = vmatprep.subr.bf16.mxu0 %v2639_v43  ;;  %v2720_v41 = vld [vmem:[#allocation7 + $0x24] ss:$8 sps:$4 sm:$0xff]   ;;  %v2760_v43 = vld [vmem:[#allocation7 + $0x140] ss:$8 sps:$4 sm:$0xff]  }
  0xc0   :  { %1538 = vmatprep.subr.bf16.mxu1 %v2636_v42  ;;  %v2718_v42 = vld [vmem:[#allocation7 + $0x20] ss:$8 sps:$4 sm:$0xff]  }
  0xc2   :  { %1502 = vmatpush1.bf16.msra.mxu0 %v2637_v45  ;;  %v2765_v45 = vld [vmem:[#allocation7 + $0x134] ss:$8 sps:$4 sm:$0xff]  }
  0xc3   :  { %1539 = vmatpush1.bf16.msra.mxu1 %v2634_v44  ;;  %1503 = vmatprep.subr.bf16.mxu0 %v2645_v46  ;;  %v2723_v44 = vld [vmem:[#allocation7 + $0x14] ss:$8 sps:$4 sm:$0xff]   ;;  %v2763_v46 = vld [vmem:[#allocation7 + $0x130] ss:$8 sps:$4 sm:$0xff]  }
  0xc4   :  { %1540 = vmatprep.subr.bf16.mxu1 %v2642_v37  ;;  %v2721_v37 = vld [vmem:[#allocation7 + $0x10] ss:$8 sps:$4 sm:$0xff]  }
  0xc6   :  { %1504 = vmatpush1.bf16.msra.mxu0 %v2643_v48  ;;  %v2768_v48 = vld [vmem:[#allocation7 + $0x124] ss:$8 sps:$4 sm:$0xff]  }
  0xc7   :  { %1541 = vmatpush1.bf16.msra.mxu1 %v2640_v47  ;;  %1505 = vmatprep.subr.bf16.mxu0 %v2651_v50  ;;  %v2726_v47 = vld [vmem:[#allocation7 + $0x4] ss:$8 sps:$4 sm:$0xff]   ;;  %v2766_v50 = vld [vmem:[#allocation7 + $0x120] ss:$8 sps:$4 sm:$0xff]  }
  0xc8   :  { %1542 = vmatprep.subr.bf16.mxu1 %v2648_v49  ;;  %v2724_v49 = vld [vmem:[#allocation7] ss:$8 sps:$4 sm:$0xff]  }
  0xca   :  { %1506 = vmatpush2.bf16.msra.mxu0 %v2649_v52  ;;  %v2771_v52 = vld [vmem:[#allocation7 + $0x114] ss:$8 sps:$4 sm:$0xff]  }
  0xcb   :  { %1543 = vmatpush1.bf16.msra.mxu1 %v2646_v51  ;;  %1507 = vmatprep.subr.bf16.mxu0 %v2657_v55  ;;  %v2729_v51 = vld [vmem:[#allocation7 + $0xf4] ss:$8 sps:$4 sm:$0xff]   ;;  %v2769_v55 = vld [vmem:[#allocation7 + $0x110] ss:$8 sps:$4 sm:$0xff]  }
  0xcc   :  { %1544 = vmatprep.subr.bf16.mxu1 %v2654_v54  ;;  %v2727_v54 = vld [vmem:[#allocation7 + $0xf0] ss:$8 sps:$4 sm:$0xff]  }
  0xce   :  { %1508 = vmatpush2.bf16.msra.mxu0 %v2655_v57  ;;  %v2774_v57 = vld [vmem:[#allocation7 + $0x104] ss:$8 sps:$4 sm:$0xff]  }
  0xcf   :  { %1545 = vmatpush1.bf16.msra.mxu1 %v2652_v56  ;;  %1509 = vmatprep.subr.bf16.mxu0 %v2663_v59  ;;  %v2732_v56 = vld [vmem:[#allocation7 + $0xe4] ss:$8 sps:$4 sm:$0xff]   ;;  %v2772_v59 = vld [vmem:[#allocation7 + $0x100] ss:$8 sps:$4 sm:$0xff]  }
  0xd0   :  { %1546 = vmatprep.subr.bf16.mxu1 %v2660_v58  ;;  %v2730_v58 = vld [vmem:[#allocation7 + $0xe0] ss:$8 sps:$4 sm:$0xff]  }
  0xd2   :  { %1510 = vmatpush2.bf16.msra.mxu0 %v2661_v61  ;;  %v2777_v61 = vld [vmem:[#allocation7 + $0x1f4] ss:$8 sps:$4 sm:$0xff]  }
  0xd3   :  { %1547 = vmatpush2.bf16.msra.mxu1 %v2658_v60  ;;  %1511 = vmatprep.subr.bf16.mxu0 %v2669_v63  ;;  %v2735_v60 = vld [vmem:[#allocation7 + $0xd4] ss:$8 sps:$4 sm:$0xff]   ;;  %v2775_v63 = vld [vmem:[#allocation7 + $0x1f0] ss:$8 sps:$4 sm:$0xff]  }
  0xd4   :  { %1548 = vmatprep.subr.bf16.mxu1 %v2666_v62  ;;  %v2733_v62 = vld [vmem:[#allocation7 + $0xd0] ss:$8 sps:$4 sm:$0xff]  }
  0xd6   :  { %1512 = vmatpush2.bf16.msra.mxu0 %v2667_v1  ;;  %v2780_v1 = vld [vmem:[#allocation7 + $0x1e4] ss:$8 sps:$4 sm:$0xff]  }
  0xd7   :  { %1549 = vmatpush2.bf16.msra.mxu1 %v2664_v0  ;;  %1513 = vmatprep.subr.bf16.mxu0 %v2675_v3  ;;  %v2738_v0 = vld [vmem:[#allocation7 + $0xc4] ss:$8 sps:$4 sm:$0xff]   ;;  %v2778_v3 = vld [vmem:[#allocation7 + $0x1e0] ss:$8 sps:$4 sm:$0xff]  }
  0xd8   :  { %1550 = vmatprep.subr.bf16.mxu1 %v2672_v2  ;;  %v2736_v2 = vld [vmem:[#allocation7 + $0xc0] ss:$8 sps:$4 sm:$0xff]  }
  0xda   :  { %1514 = vmatpush2.bf16.msra.mxu0 %v2673_v5  ;;  %v2783_v5 = vld [vmem:[#allocation7 + $0x1d4] ss:$8 sps:$4 sm:$0xff]  }
  0xdb   :  { %1551 = vmatpush2.bf16.msra.mxu1 %v2670_v4  ;;  %1515 = vmatprep.subr.bf16.mxu0 %v2681_v7  ;;  %v2741_v4 = vld [vmem:[#allocation7 + $0xb4] ss:$8 sps:$4 sm:$0xff]   ;;  %v2781_v7 = vld [vmem:[#allocation7 + $0x1d0] ss:$8 sps:$4 sm:$0xff]  }
  0xdc   :  { %1552 = vmatprep.subr.bf16.mxu1 %v2678_v6  ;;  %v2739_v6 = vld [vmem:[#allocation7 + $0xb0] ss:$8 sps:$4 sm:$0xff]  }
  0xde   :  { %1516 = vmatpush2.bf16.msra.mxu0 %v2679_v11  ;;  %v2786_v11 = vld [vmem:[#allocation7 + $0x1c4] ss:$8 sps:$4 sm:$0xff]  }
  0xdf   :  { %1553 = vmatpush2.bf16.msra.mxu1 %v2676_v8  ;;  %1517 = vmatprep.subr.bf16.mxu0 %v2687_v13  ;;  %v2744_v8 = vld [vmem:[#allocation7 + $0xa4] ss:$8 sps:$4 sm:$0xff]   ;;  %v2784_v13 = vld [vmem:[#allocation7 + $0x1c0] ss:$8 sps:$4 sm:$0xff]  }
  0xe0   :  { %1554 = vmatprep.subr.bf16.mxu1 %v2684_v12  ;;  %v2742_v12 = vld [vmem:[#allocation7 + $0xa0] ss:$8 sps:$4 sm:$0xff]  }
  0xe2   :  { %1518 = vmatpush2.bf16.msra.mxu0 %v2685_v15  ;;  %v2745_v15 = vld [vmem:[#allocation7 + $0x90] ss:$8 sps:$4 sm:$0xff]  }
  0xe3   :  { %1555 = vmatpush2.bf16.msra.mxu1 %v2682_v14  ;;  %1519 = vmatprep.subr.bf16.mxu0 %v2693_v18  ;;  %v2747_v14 = vld [vmem:[#allocation7 + $0x94] ss:$8 sps:$4 sm:$0xff]  }
  0xe4   :  { %1556 = vmatprep.subr.bf16.mxu1 %v2690_v16  ;;  %v2750_v16 = vld [vmem:[#allocation7 + $0x84] ss:$8 sps:$4 sm:$0xff]  }
  0xe6   :  { %1520 = vmatpush2.bf16.msra.mxu0 %v2691_v22  ;;  %v2748_v22 = vld [vmem:[#allocation7 + $0x80] ss:$8 sps:$4 sm:$0xff]  }
  0xe7   :  { %1557 = vmatpush2.bf16.msra.mxu1 %v2688_v19  ;;  %1585 = vmatprep.subr.bf16.mxu0 %v2699_v24 }
  0xe8   :  { %1558 = vmatprep.subr.bf16.mxu1 %v2696_v23 }
  0xe9   :  { %1522 = vmatmul.mubr.bf16.vlgmr.msra.gmra.mxu0 %v2935_v10  ;;  %v2709_v10 = vld [vmem:[#allocation7 + $0x50] ss:$8 sps:$4 sm:$0xff]  }
  0xea   :  { %1586 = vmatpush1.bf16.msra.mxu0 %v2697_v26  ;;  %1603 = vmatprep.mubr.bf16.mxu0 %v2874_v17  ;;  %v2756_v17 = vld [vmem:[#allocation7 + $0x164] ss:$8 sps:$4 sm:$0xff]   ;;  %v2787_v26 = vld [vmem:[#allocation7 + $0x1b0] ss:$8 sps:$4 sm:$0xff]  }
  0xeb   :  { %1559 = vmatpush2.bf16.msra.mxu1 %v2694_v25  ;;  %2016 = vmatprep.subr.bf16.mxu0 %v2705_v28  ;;  %v2789_v25 = vld [vmem:[#allocation7 + $0x1b4] ss:$8 sps:$4 sm:$0xff]  }
  0xec   :  { %1560 = vmatprep.subr.bf16.mxu1 %v2702_v27 }
  0xef   :  { %1561 = vmatpush2.bf16.msra.mxu1 %v2700_v29 }
  0xf0   :  { %2057 = vmatprep.subr.bf16.mxu1 %v2753_v36 }
  0xf1   :  { %2335 = vmatmul.mubr.msk.bf16.vlgmr.msra.gmra.mxu0 %vm1280_vm0, %v2940_v20  ;;  %v2759_v20 = vld [vmem:[#allocation7 + $0x154] ss:$8 sps:$4 sm:$0xff]  }
  0xf2   :  { %1563 = vmatmul.mubr.bf16.vlgmr.msra.gmra.mxu1 %v2948_v21  ;;  %2017 = vmatpush1.bf16.msra.mxu0 %v2703_v30  ;;  %v2717_v21 = vld [vmem:[#allocation7 + $0x34] ss:$8 sps:$4 sm:$0xff]  }
  0xf3   :  { %2018 = vmatprep.subr.bf16.mxu0 %v2708_v31  ;;  %2058 = vmatpush1.bf16.msra.mxu1 %v2751_v35  ;;  %v2792_v31 = vld [vmem:[#allocation7 + $0x1a4] ss:$8 sps:$4 sm:$0xff]   ;;  %v2793_v35 = vld [vmem:[#allocation7 + $0x190] ss:$8 sps:$4 sm:$0xff]  }
  0xf4   :  { %2059 = vmatprep.subr.bf16.mxu1 %v2756_v17 }
  0xf6   :  { %2019 = vmatpush1.bf16.msra.mxu0 %v2706_v32  ;;  %v2790_v32 = vld [vmem:[#allocation7 + $0x1a0] ss:$8 sps:$4 sm:$0xff]  }
  0xf7   :  { %2020 = vmatprep.subr.bf16.mxu0 %v2711_v33  ;;  %2060 = vmatpush1.bf16.msra.mxu1 %v2754_v53  ;;  %v2796_v53 = vld [vmem:[#allocation7 + $0x180] ss:$8 sps:$4 sm:$0xff]  }
  0xf8   :  { %2061 = vmatprep.subr.bf16.mxu1 %v2759_v20 }
  0xfa   :  { %2021 = vmatpush1.bf16.msra.mxu0 %v2709_v10 }
  0xfb   :  { %2022 = vmatprep.subr.bf16.mxu0 %v2714_v34  ;;  %2062 = vmatpush1.bf16.msra.mxu1 %v2757_v40  ;;  %v2795_v34 = vld [vmem:[#allocation7 + $0x194] ss:$8 sps:$4 sm:$0xff]   ;;  %v278_v40 = vld [vmem:[%s2983_s2] sm:$0xf] }
  0xfc   :  { %2063 = vmatprep.subr.bf16.mxu1 %v2762_v9 }
  0xfe   :  { %2023 = vmatpush1.bf16.msra.mxu0 %v2712_v38  ;;  %v2798_v38 = vld [vmem:[#allocation7 + $0x184] ss:$8 sps:$4 sm:$0xff]  }
  0xff   :  { %2024 = vmatprep.subr.bf16.mxu0 %v2717_v21  ;;  %2064 = vmatpush1.bf16.msra.mxu1 %v2760_v43  ;;  %v280_v21 = vlaneseq }
 0x100   :  { %2065 = vmatprep.subr.bf16.mxu1 %v2765_v45 }
 0x101   :  { %v281_v20 = vshrl.u32 %v280_v21, 7  ;;  %v2100_v21 = vld [vmem:[%s2986_s5] sm:$0x3] }
 0x102   :  { %2025 = vmatpush1.bf16.msra.mxu0 %v2715_v39 }
 0x103   :  { %2026 = vmatprep.subr.bf16.mxu0 %v2720_v41  ;;  %2066 = vmatpush1.bf16.msra.mxu1 %v2763_v46  ;;  %v2959_v39 = vsub.s32 0, %v281_v20  ;;  %v2964_v41 = vsub.s32 1, %v281_v20 }
 0x104   :  { %2067 = vmatprep.subr.bf16.mxu1 %v2768_v48 }
 0x105   :  { %v283_v9 = vrot.slane %v278_v40, %v2959_v39 }
 0x106   :  { %2027 = vmatpush1.bf16.msra.mxu0 %v2718_v42  ;;  %v287_v42 = vrot.slane %v278_v40, %v2964_v41 }
 0x107   :  { %2028 = vmatprep.subr.bf16.mxu0 %v2723_v44  ;;  %2068 = vmatpush1.bf16.msra.mxu1 %v2766_v50 }
 0x108   :  { %2069 = vmatprep.subr.bf16.mxu1 %v2771_v52 }
 0x10a   :  { %2029 = vmatpush1.bf16.msra.mxu0 %v2721_v37 }
 0x10b   :  { %2030 = vmatprep.subr.bf16.mxu0 %v2726_v47  ;;  %2070 = vmatpush1.bf16.msra.mxu1 %v2769_v55 }
 0x10c   :  { %2071 = vmatprep.subr.bf16.mxu1 %v2774_v57 }
 0x10e   :  { %2031 = vmatpush1.bf16.msra.mxu0 %v2724_v49 }
 0x10f   :  { %2032 = vmatprep.subr.bf16.mxu0 %v2729_v51  ;;  %2072 = vmatpush1.bf16.msra.mxu1 %v2772_v59 }
 0x110   :  { %2073 = vmatprep.subr.bf16.mxu1 %v2777_v61 }
 0x112   :  { %2033 = vmatpush2.bf16.msra.mxu0 %v2727_v54 }
 0x113   :  { %2034 = vmatprep.subr.bf16.mxu0 %v2732_v56  ;;  %2074 = vmatpush2.bf16.msra.mxu1 %v2775_v63  ;;  %v290_v63 = vsub.s32 2, %v281_v20 }
 0x114   :  { %2075 = vmatprep.subr.bf16.mxu1 %v2780_v1 }
 0x116   :  { %2035 = vmatpush2.bf16.msra.mxu0 %v2730_v58 }
 0x117   :  { %2036 = vmatprep.subr.bf16.mxu0 %v2735_v60  ;;  %2076 = vmatpush2.bf16.msra.mxu1 %v2778_v3 }
 0x118   :  { %2077 = vmatprep.subr.bf16.mxu1 %v2783_v5 }
 0x11a   :  { %2037 = vmatpush2.bf16.msra.mxu0 %v2733_v62 }
 0x11b   :  { %2038 = vmatprep.subr.bf16.mxu0 %v2738_v0  ;;  %2078 = vmatpush2.bf16.msra.mxu1 %v2781_v7  ;;  %v294_v0 = vsub.s32 3, %v281_v20 }
 0x11c   :  { %2079 = vmatprep.subr.bf16.mxu1 %v2786_v11 }
 0x11e   :  { %2039 = vmatpush2.bf16.msra.mxu0 %v2736_v2  ;;  %v291_v2 = vrot.slane %v278_v40, %v290_v63 }
 0x11f   :  { %2040 = vmatprep.subr.bf16.mxu0 %v2741_v4  ;;  %2080 = vmatpush2.bf16.msra.mxu1 %v2784_v13  ;;  %v295_v4 = vrot.slane %v278_v40, %v294_v0 }
 0x120   :  { %2081 = vmatprep.subr.bf16.mxu1 %v2789_v25 }
 0x122   :  { %2041 = vmatpush2.bf16.msra.mxu0 %v2739_v6 }
 0x123   :  { %2042 = vmatprep.subr.bf16.mxu0 %v2744_v8  ;;  %2082 = vmatpush2.bf16.msra.mxu1 %v2787_v26 }
 0x124   :  { %2083 = vmatprep.subr.bf16.mxu1 %v2792_v31 }
 0x126   :  { %2043 = vmatpush2.bf16.msra.mxu0 %v2742_v12 }
 0x127   :  { %2044 = vmatprep.subr.bf16.mxu0 %v2747_v14  ;;  %2084 = vmatpush2.bf16.msra.mxu1 %v2790_v32 }
 0x128   :  { %2085 = vmatprep.subr.bf16.mxu1 %v2795_v34 }
 0x129   :  { %v1318_v18 = vpop.f32.mrf.mxu0 }
 0x12a   :  { %v1359_v19 = vpop.f32.mrf.mxu1  ;;  %2045 = vmatpush2.bf16.msra.mxu0 %v2745_v15  ;;  %v1319_v43 = vadd.f32 %v1318_v18, %v283_v9 }
 0x12b   :  { %v1320_v23 = vpop.f32.mrf.mxu0  ;;  %2046 = vmatprep.subr.bf16.mxu0 %v2750_v16  ;;  %2086 = vmatpush2.bf16.msra.mxu1 %v2793_v35  ;;  %v1684_v35 = vld [vmem:[%s2985_s4] sm:$0x3] }
 0x12c   :  { %v1361_v24 = vpop.f32.mrf.mxu1  ;;  %2087 = vmatprep.subr.bf16.mxu1 %v2798_v38  ;;  %v1321_v44 = vadd.f32 %v1320_v23, %v287_v42  ;;  %v1360_v45 = vadd.f32 %v1359_v19, %v1319_v43 }
 0x12d   :  { %v1322_v27 = vpop.f32.mrf.mxu0 }
 0x12e   :  { %v1363_v28 = vpop.f32.mrf.mxu1  ;;  %2047 = vmatpush2.bf16.msra.mxu0 %v2748_v22  ;;  %v1362_v46 = vadd.f32 %v1361_v24, %v1321_v44  ;;  %v2105_v44 = vrot.slane %v2100_v21, %v2959_v39 }
 0x12f   :  { %v1323_v29 = vpop.f32.mrf.mxu0  ;;  %2088 = vmatpush2.bf16.msra.mxu1 %v2796_v53 }
 0x130   :  { %v1364_v30 = vpop.f32.mrf.mxu1 }
 0x132   :  { %v1441_v33 = vpop.f32.mrf.mxu1 }
 0x134   :  { %v1443_v10 = vpop.f32.mrf.mxu1 }
 0x136   :  { %v1445_v36 = vpop.f32.mrf.mxu1 }
 0x137   :  { %v1689_v36 = vrot.slane %v1684_v35, %v2959_v39 }
 0x138   :  { %v1446_v17 = vpop.f32.mrf.mxu1 }
 0x139   :  { %v1693_v17 = vrot.slane %v1684_v35, %v2964_v41 }
 0x169   :  { %v1400_v37 = vpop.f32.mrf.mxu0 }
 0x16a   :  { %v1401_v47 = vadd.f32 %v1400_v37, %v1360_v45  ;;  %v2109_v45 = vrot.slane %v2100_v21, %v2964_v41 }
 0x16b   :  { %v1402_v48 = vpop.f32.mrf.mxu0 }
 0x16c   :  { %v1442_v49 = vadd.f32 %v1441_v33, %v1401_v47  ;;  %v1403_v50 = vadd.f32 %v1402_v48, %v1362_v46 }
 0x16d   :  { %v1404_v51 = vpop.f32.mrf.mxu0 }
 0x16e   :  { %v1444_v52 = vadd.f32 %v1443_v10, %v1403_v50  ;;  %v1612_v54 = vmax.f32 %v1442_v49, 0.0  ;;  %v2400_v51 = vld [vmem:[#allocation2] ss:$0 sm:$0xff] }
 0x16f   :  { %v1405_v55 = vpop.f32.mrf.mxu0 }
 0x170   :  { %v1613_v56 = vmax.f32 %v1444_v52, 0.0  ;;  %v1616_v59 = vpack.c.bf16 %v1612_v54, %v1612_v54 }
 0x172   :  { %v1482_v57 = vpop.f32.mrf.mxu1  ;;  %v1617_v58 = vpack.c.bf16 %v1613_v56, %v1613_v56 }
 0x173   :  { %v1483_v6 = vadd.f32 %v1482_v57, %v291_v2 }
 0x174   :  { %v1484_v60 = vpop.f32.mrf.mxu1  ;;  %2048 = vmatprep.mubr.bf16.mxu0 %v1617_v58 }
 0x175   :  { %2049 = vmatmul.mubr.bf16.vlgmr.msra.gmra.mxu0 %v1616_v59  ;;  %v1485_v8 = vadd.f32 %v1484_v60, %v295_v4 }
 0x176   :  { %v1486_v61 = vpop.f32.mrf.mxu1 }
 0x178   :  { %v1487_v62 = vpop.f32.mrf.mxu1 }
 0x1a9   :  { %v1523_v1 = vpop.f32.mrf.mxu0 }
 0x1aa   :  { %v1524_v11 = vadd.f32 %v1523_v1, %v1483_v6 }
 0x1ab   :  { %v1525_v3 = vpop.f32.mrf.mxu0 }
 0x1ac   :  { %v1526_v14 = vadd.f32 %v1525_v3, %v1485_v8 }
 0x1ad   :  { %v1527_v5 = vpop.f32.mrf.mxu0 }
 0x1af   :  { %v1528_v7 = vpop.f32.mrf.mxu0 }
 0x1b1   :  { %v1605_v13 = vpop.f32.mrf.mxu0 }
 0x1b2   :  { %v1564_v12 = vpop.f32.mrf.mxu1 }
 0x1b3   :  { %v1565_v15 = vadd.f32 %v1564_v12, %v1524_v11  ;;  %v1607_v18 = vpop.f32.mrf.mxu0 }
 0x1b4   :  { %v1566_v16 = vpop.f32.mrf.mxu1 }
 0x1b5   :  { %v1606_v19 = vadd.f32 %v1605_v13, %v1565_v15  ;;  %v1567_v22 = vadd.f32 %v1566_v16, %v1526_v14  ;;  %v1609_v24 = vpop.f32.mrf.mxu0 }
 0x1b6   :  { %v1568_v23 = vpop.f32.mrf.mxu1 }
 0x1b7   :  { %v1608_v25 = vadd.f32 %v1607_v18, %v1567_v22  ;;  %v1614_v26 = vmax.f32 %v1606_v19, 0.0  ;;  %v1610_v28 = vpop.f32.mrf.mxu0 }
 0x1b8   :  { %v1569_v27 = vpop.f32.mrf.mxu1 }
 0x1b9   :  { %v1615_v29 = vmax.f32 %v1608_v25, 0.0  ;;  %v1618_v31 = vpack.c.bf16 %v1614_v26, %v1614_v26 }
 0x1bb   :  { %v1619_v30 = vpack.c.bf16 %v1615_v29, %v1615_v29 }
 0x1bd   :  { %2089 = vmatprep.mubr.bf16.mxu1 %v1619_v30 }
 0x1be   :  { %2090 = vmatmul.mubr.bf16.vlgmr.msra.gmra.mxu1 %v1618_v31 }
 0x235   :  { %v2050_v32 = vpop.f32.mrf.mxu0 }
 0x236   :  { %v2051_v38 = vadd.f32 %v2050_v32, %v1689_v36 }
 0x237   :  { %v2052_v33 = vpop.f32.mrf.mxu0 }
 0x238   :  { %v2053_v20 = vadd.f32 %v2052_v33, %v1693_v17 }
 0x239   :  { %v2054_v10 = vpop.f32.mrf.mxu0 }
 0x23b   :  { %v2055_v34 = vpop.f32.mrf.mxu0 }
 0x27e   :  { %v2091_v53 = vpop.f32.mrf.mxu1 }
 0x27f   :  { %v2092_v40 = vadd.f32 %v2091_v53, %v2051_v38 }
 0x280   :  { %v2093_v9 = vpop.f32.mrf.mxu1 }
 0x281   :  { %v2098_v42 = vmax.f32 %v2092_v40, 0.0  ;;  %v2094_v43 = vadd.f32 %v2093_v9, %v2053_v20 }
 0x282   :  { %v2095_v37 = vpop.f32.mrf.mxu1 }
 0x283   :  { %v2099_v46 = vmax.f32 %v2094_v43, 0.0  ;;  %v2112_v48 = vmul.f32 %v2105_v44, %v2098_v42 }
 0x284   :  { %v2096_v47 = vpop.f32.mrf.mxu1 }
 0x285   :  { %v2113_v49 = vmul.f32 %v2109_v45, %v2099_v46 }
 0x287   :  { %v2114_v50 = vadd.f32 %v2113_v49, %v2112_v48 }
 0x289   :  { %2115 = vadd.xlane.f32.xlu0 %v2114_v50 }
 0x312   :  { %v2116_v52 = vpop.xlane.xlu0 %2115 }
 0x313   :  { %v2124_v54 = vadd.f32 %v2400_v51, %v2116_v52 }
 0x315   :  { %v2125_v55 = vsub.f32 0.0, %v2124_v54 }
 0x317   :  { %v2126_v56 = vmul.f32 1.442695, %v2125_v55 }
 0x319   :  { %2799 = vpow2.f32 %v2126_v56 }
 0x326   :  { %v2800_v57 = vpop.eup %2799 }
 0x327   :  { %v2128_v58 = vadd.f32 1.0, %v2800_v57 }
 0x329   :  { %2801 = vrcp.f32 %v2128_v58 }
 0x336   :  { %v2802_v39 = vpop.eup %2801 }
 0x337   :  { %2131 = vst.msk [vmem:[%s2988_s7] sm:$0xff] %vm2130_vm1, %v2802_v39 }
 0x338   :  { %2136 = vsyncpa [#allocation4], 1 }
 0x339   :  { %2137 = vsyncpa [#allocation6], 1 }

</bundles_post_ra>
